<compile_context>
chip_gen: v7x
topology: tpu7x:2x2x1
jax: 0.10.0
libtpu: 0.0.40
codegen_flags: <defaults>
</compile_context>

<pallas_src>
import functools

import jax
import jax.numpy as jnp
from jax import lax
from jax.experimental import pallas as pl
from jax.experimental.pallas import tpu as pltpu

_LANE = 128  # vreg lane width


def _round_up(x, m):
    return ((x + m - 1) // m) * m


def _pad_to(a, target, axis):
    pad = target - a.shape[axis]
    if pad == 0:
        return a
    widths = [(0, 0)] * a.ndim
    widths[axis] = (0, pad)
    return jnp.pad(a, widths)


def _mlp_kernel(x_ref, w1_ref, b1_ref, w2_ref, b2_ref, w3_ref, b3_ref, o_ref,
                *, sub, n_chunks):
    """Fused 3-layer MLP.

    Hidden matmuls: bf16 MXU operands, f32 accumulation; bias add / ReLU in f32
    on the VPU.  Final (value-head) matmul stays f32.  The batch tile is
    processed in `sub`-row chunks (unrolled fori_loop) so live f32
    intermediates stay small even for large batch tiles.
    """
    w1 = w1_ref[...]   # bf16 [in, h_p]
    b1 = b1_ref[...]   # f32  [1, h_p]
    w2 = w2_ref[...]   # bf16 [h_p, h_p]
    b2 = b2_ref[...]   # f32  [1, h_p]
    w3 = w3_ref[...]   # f32  [h_p, out]
    b3 = b3_ref[...]   # f32  [1, out]

    def compute(x):
        xb = x.astype(jnp.bfloat16)
        h1 = jnp.dot(xb, w1, preferred_element_type=jnp.float32)
        h1 = jnp.maximum(h1 + b1, 0.0).astype(jnp.bfloat16)
        h2 = jnp.dot(h1, w2, preferred_element_type=jnp.float32)
        h2 = jnp.maximum(h2 + b2, 0.0)
        return jnp.dot(h2, w3, preferred_element_type=jnp.float32) + b3

    if n_chunks == 1:
        o_ref[...] = compute(x_ref[...]).astype(o_ref.dtype)
    else:
        def body(c, carry):
            r = pl.multiple_of(c * sub, sub)
            out = compute(x_ref[pl.ds(r, sub), :])
            o_ref[pl.ds(r, sub), :] = out.astype(o_ref.dtype)
            return carry
        lax.fori_loop(0, n_chunks, body, 0, unroll=True)


def prepare_params(w1, b1, w2, b2, w3, b3):
    """Pad the hidden dim to a lane multiple and cast ONCE, outside the jitted
    forward.  Zero padding is exact: padded hidden units are ReLU(0)=0 and hit
    zero rows of the next weight.  The value head (w3/b3) stays f32."""
    hidden = w1.shape[1]
    h_p = _round_up(hidden, _LANE)
    w1p = _pad_to(w1, h_p, 1).astype(jnp.bfloat16)
    b1p = _pad_to(b1, h_p, 1).astype(jnp.float32)
    w2p = _pad_to(_pad_to(w2, h_p, 0), h_p, 1).astype(jnp.bfloat16)
    b2p = _pad_to(b2, h_p, 1).astype(jnp.float32)
    w3p = _pad_to(w3, h_p, 0).astype(jnp.float32)
    b3p = b3.astype(jnp.float32)
    return w1p, b1p, w2p, b2p, w3p, b3p


@functools.partial(jax.jit, static_argnames=("block_b", "sub_rows"))
def value_network_forward(x, w1p, b1p, w2p, b2p, w3p, b3p, *,
                          block_b=1024, sub_rows=256):
    """Fused forward pass.  x: [B, input_size] (f32); params from prepare_params.
    Returns [B, output_size] in x.dtype."""
    out_dtype = x.dtype
    B, in_size = x.shape
    h_p = w1p.shape[1]
    out_size = w3p.shape[1]

    x_bytes = jnp.dtype(x.dtype).itemsize
    o_bytes = jnp.dtype(out_dtype).itemsize

    # Batch tile: single large tile when the batch fits (block dim == full dim
    # is always legal); otherwise a sublane-aligned tile.  No forced 2-way
    # split -- grid steps are a sequential loop on 1-TC chips (v5e/v6e); big
    # batches still get multiple "parallel" steps for v7x's two cores.
    tb = min(block_b, B)
    if tb < B:
        tb = _round_up(tb, 8)
    grid = (pl.cdiv(B, tb),)

    # Sub-chunk the tile to bound live f32 intermediates (vreg/VMEM pressure).
    if tb >= sub_rows and tb % sub_rows == 0:
        sub, n_chunks = sub_rows, tb // sub_rows
    else:
        sub, n_chunks = tb, 1

    # VMEM budget from the real footprint (double-buffered operands + live
    # intermediates), 2x headroom, capped below v7x's 64 MiB physical VMEM.
    bf16_b, f32_b = 2, 4
    weight_bytes = (w1p.size + w2p.size) * bf16_b + w3p.size * f32_b
    bias_bytes = (b1p.size + b2p.size + b3p.size) * f32_b
    io_bytes = 2 * tb * in_size * x_bytes + 2 * tb * out_size * o_bytes
    live_bytes = sub * (2 * h_p * f32_b + h_p * bf16_b + out_size * f32_b)
    vmem_limit = 2 * (2 * (weight_bytes + bias_bytes) + io_bytes + live_bytes)
    vmem_limit = int(min(max(vmem_limit, 16 << 20), 48 << 20))

    # Actual work of this kernel (only the hidden dim is padded; those weights
    # really are fetched and those MACs really execute).
    flops = 2 * B * (in_size * h_p + h_p * h_p + h_p * out_size)
    bytes_accessed = (B * in_size * x_bytes + weight_bytes + bias_bytes
                      + B * out_size * o_bytes)

    kernel = functools.partial(_mlp_kernel, sub=sub, n_chunks=n_chunks)

    return pl.pallas_call(
        kernel,
        out_shape=jax.ShapeDtypeStruct((B, out_size), out_dtype),
        grid=grid,
        in_specs=[
            pl.BlockSpec((tb, in_size), lambda i: (i, 0)),      # x tile
            pl.BlockSpec((in_size, h_p), lambda i: (0, 0)),     # w1 (bf16)
            pl.BlockSpec((1, h_p), lambda i: (0, 0)),           # b1 (f32)
            pl.BlockSpec((h_p, h_p), lambda i: (0, 0)),         # w2 (bf16)
            pl.BlockSpec((1, h_p), lambda i: (0, 0)),           # b2 (f32)
            pl.BlockSpec((h_p, out_size), lambda i: (0, 0)),    # w3 (f32)
            pl.BlockSpec((1, out_size), lambda i: (0, 0)),      # b3 (f32)
        ],
        out_specs=pl.BlockSpec((tb, out_size), lambda i: (i, 0)),
        compiler_params=pltpu.CompilerParams(
            dimension_semantics=("parallel",),
            vmem_limit_bytes=vmem_limit,
        ),
        cost_estimate=pl.CostEstimate(
            flops=flops, transcendentals=0, bytes_accessed=bytes_accessed),
    )(x, w1p, b1p, w2p, b2p, w3p, b3p)


def init_params(key, input_size, hidden_size, output_size, dtype=jnp.float32):
    """Deterministic init mimicking PyTorch nn.Linear defaults
    (uniform(-1/sqrt(fan_in), 1/sqrt(fan_in)))."""
    def linear(k, fan_in, fan_out):
        kw, kb = jax.random.split(k)
        bound = 1.0 / jnp.sqrt(fan_in)
        w = jax.random.uniform(kw, (fan_in, fan_out), dtype, -bound, bound)
        b = jax.random.uniform(kb, (1, fan_out), dtype, -bound, bound)
        return w, b

    k1, k2, k3 = jax.random.split(key, 3)
    w1, b1 = linear(k1, input_size, hidden_size)
    w2, b2 = linear(k2, hidden_size, hidden_size)
    w3, b3 = linear(k3, hidden_size, output_size)
    return w1, b1, w2, b2, w3, b3


def reference_forward(x, w1, b1, w2, b2, w3, b3):
    h1 = jnp.maximum(x @ w1 + b1, 0.0)
    h2 = jnp.maximum(h1 @ w2 + b2, 0.0)
    return h2 @ w3 + b3


if __name__ == "__main__":
    # Small shapes consistent with the module: batch=8, input=16, hidden=32, output=4.
    batch, input_size, hidden_size, output_size = 8, 16, 32, 4

    key = jax.random.PRNGKey(0)
    kx, kp = jax.random.split(key)
    x = jax.random.normal(kx, (batch, input_size), jnp.float32)
    raw_params = init_params(kp, input_size, hidden_size, output_size)
    params = prepare_params(*raw_params)   # pad/cast once, not per forward call

    out = jax.block_until_ready(value_network_forward(x, *params))

    ref = reference_forward(x, *raw_params)
    assert out.shape == (batch, output_size), out.shape
    assert out.dtype == x.dtype
    # bf16 hidden matmuls with f32 accumulation (value head in f32): ~1e-2 error.
    max_err = float(jnp.max(jnp.abs(out - ref)))
    assert max_err < 5e-2, f"max abs error {max_err}"

    print("KERNEL_OK")
</pallas_src>

<mosaic_0001>
module attributes {stable_mosaic.version = 11 : i64} {
  func.func @_mlp_kernel(%arg0: i32, %arg1: memref<8x16xf32, #tpu.memory_space<vmem>>, %arg2: memref<16x128xbf16, #tpu.memory_space<vmem>>, %arg3: memref<1x128xf32, #tpu.memory_space<vmem>>, %arg4: memref<128x128xbf16, #tpu.memory_space<vmem>>, %arg5: memref<1x128xf32, #tpu.memory_space<vmem>>, %arg6: memref<128x4xf32, #tpu.memory_space<vmem>>, %arg7: memref<1x4xf32, #tpu.memory_space<vmem>>, %arg8: memref<8x4xf32, #tpu.memory_space<vmem>>) attributes {dimension_semantics = [#tpu.dimension_semantics<parallel>], iteration_bounds = array<i64: 1>, scalar_prefetch = 0 : i64, scratch_operands = 0 : i64, tpu.core_type = #tpu.core_type<tc>, window_params = [{transform_indices = @transform_0, window_bounds = array<i64: 8, 16>}, {pipeline_mode = #tpu.pipeline_mode<synchronous>, transform_indices = @transform_1, window_bounds = array<i64: 16, 128>}, {pipeline_mode = #tpu.pipeline_mode<synchronous>, transform_indices = @transform_2, window_bounds = array<i64: 1, 128>}, {pipeline_mode = #tpu.pipeline_mode<synchronous>, transform_indices = @transform_3, window_bounds = array<i64: 128, 128>}, {pipeline_mode = #tpu.pipeline_mode<synchronous>, transform_indices = @transform_4, window_bounds = array<i64: 1, 128>}, {pipeline_mode = #tpu.pipeline_mode<synchronous>, transform_indices = @transform_5, window_bounds = array<i64: 128, 4>}, {pipeline_mode = #tpu.pipeline_mode<synchronous>, transform_indices = @transform_6, window_bounds = array<i64: 1, 4>}, {transform_indices = @transform_7, window_bounds = array<i64: 8, 4>}]} {
    %c0 = arith.constant 0 : index
    %c0_0 = arith.constant 0 : index
    %0 = vector.load %arg2[%c0, %c0_0] : memref<16x128xbf16, #tpu.memory_space<vmem>>, vector<16x128xbf16>
    %c0_1 = arith.constant 0 : index
    %c0_2 = arith.constant 0 : index
    %1 = vector.load %arg3[%c0_1, %c0_2] : memref<1x128xf32, #tpu.memory_space<vmem>>, vector<1x128xf32>
    %c0_3 = arith.constant 0 : index
    %c0_4 = arith.constant 0 : index
    %2 = vector.load %arg4[%c0_3, %c0_4] : memref<128x128xbf16, #tpu.memory_space<vmem>>, vector<128x128xbf16>
    %c0_5 = arith.constant 0 : index
    %c0_6 = arith.constant 0 : index
    %3 = vector.load %arg5[%c0_5, %c0_6] : memref<1x128xf32, #tpu.memory_space<vmem>>, vector<1x128xf32>
    %c0_7 = arith.constant 0 : index
    %c0_8 = arith.constant 0 : index
    %4 = vector.load %arg6[%c0_7, %c0_8] : memref<128x4xf32, #tpu.memory_space<vmem>>, vector<128x4xf32>
    %c0_9 = arith.constant 0 : index
    %c0_10 = arith.constant 0 : index
    %5 = vector.load %arg7[%c0_9, %c0_10] : memref<1x4xf32, #tpu.memory_space<vmem>>, vector<1x4xf32>
    %c0_11 = arith.constant 0 : index
    %c0_12 = arith.constant 0 : index
    %6 = vector.load %arg1[%c0_11, %c0_12] : memref<8x16xf32, #tpu.memory_space<vmem>>, vector<8x16xf32>
    %7 = arith.truncf %6 : vector<8x16xf32> to vector<8x16xbf16>
    %cst = arith.constant dense<0.000000e+00> : vector<8x128xf32>
    %8 = tpu.matmul %7, %0, %cst {dimension_numbers = #tpu.dot_dimension_numbers<[1], [0], [0], [1], [0, 0, 1, 1], [], []>} : vector<8x16xbf16>, vector<16x128xbf16>, vector<8x128xf32> -> vector<8x128xf32>
    %9 = vector.broadcast %1 : vector<1x128xf32> to vector<8x128xf32>
    %10 = arith.addf %8, %9 : vector<8x128xf32>
    %cst_13 = arith.constant 0.000000e+00 : f32
    %11 = vector.broadcast %cst_13 : f32 to vector<8x128xf32>
    %12 = arith.maximumf %10, %11 : vector<8x128xf32>
    %13 = arith.truncf %12 : vector<8x128xf32> to vector<8x128xbf16>
    %cst_14 = arith.constant dense<0.000000e+00> : vector<8x128xf32>
    %14 = tpu.matmul %13, %2, %cst_14 {dimension_numbers = #tpu.dot_dimension_numbers<[1], [0], [0], [1], [0, 0, 1, 1], [], []>} : vector<8x128xbf16>, vector<128x128xbf16>, vector<8x128xf32> -> vector<8x128xf32>
    %15 = vector.broadcast %3 : vector<1x128xf32> to vector<8x128xf32>
    %16 = arith.addf %14, %15 : vector<8x128xf32>
    %cst_15 = arith.constant 0.000000e+00 : f32
    %17 = vector.broadcast %cst_15 : f32 to vector<8x128xf32>
    %18 = arith.maximumf %16, %17 : vector<8x128xf32>
    %cst_16 = arith.constant dense<0.000000e+00> : vector<8x4xf32>
    %19 = tpu.matmul %18, %4, %cst_16 {dimension_numbers = #tpu.dot_dimension_numbers<[1], [0], [0], [1], [0, 0, 1, 1], [], []>} : vector<8x128xf32>, vector<128x4xf32>, vector<8x4xf32> -> vector<8x4xf32>
    %20 = vector.broadcast %5 : vector<1x4xf32> to vector<8x4xf32>
    %21 = arith.addf %19, %20 : vector<8x4xf32>
    %c0_17 = arith.constant 0 : index
    %c0_18 = arith.constant 0 : index
    %22 = vector.load %arg8[%c0_17, %c0_18] : memref<8x4xf32, #tpu.memory_space<vmem>>, vector<8x4xf32>
    tpu.vector_store %arg8[%c0_17, %c0_18], %21 {strides = array<i32>} : memref<8x4xf32, #tpu.memory_space<vmem>>, vector<8x4xf32>,
    return
  }
  func.func @transform_0(%arg0: i32) -> (i32, i32) {
    %c0_i32 = arith.constant 0 : i32
    %c0_i32_0 = arith.constant 0 : i32
    return %arg0, %c0_i32 : i32, i32
  }
  func.func @transform_1(%arg0: i32) -> (i32, i32) {
    %c0_i32 = arith.constant 0 : i32
    %c0_i32_0 = arith.constant 0 : i32
    %c0_i32_1 = arith.constant 0 : i32
    return %c0_i32, %c0_i32_0 : i32, i32
  }
  func.func @transform_2(%arg0: i32) -> (i32, i32) {
    %c0_i32 = arith.constant 0 : i32
    %c0_i32_0 = arith.constant 0 : i32
    %c0_i32_1 = arith.constant 0 : i32
    return %c0_i32, %c0_i32_0 : i32, i32
  }
  func.func @transform_3(%arg0: i32) -> (i32, i32) {
    %c0_i32 = arith.constant 0 : i32
    %c0_i32_0 = arith.constant 0 : i32
    %c0_i32_1 = arith.constant 0 : i32
    return %c0_i32, %c0_i32_0 : i32, i32
  }
  func.func @transform_4(%arg0: i32) -> (i32, i32) {
    %c0_i32 = arith.constant 0 : i32
    %c0_i32_0 = arith.constant 0 : i32
    %c0_i32_1 = arith.constant 0 : i32
    return %c0_i32, %c0_i32_0 : i32, i32
  }
  func.func @transform_5(%arg0: i32) -> (i32, i32) {
    %c0_i32 = arith.constant 0 : i32
    %c0_i32_0 = arith.constant 0 : i32
    %c0_i32_1 = arith.constant 0 : i32
    return %c0_i32, %c0_i32_0 : i32, i32
  }
  func.func @transform_6(%arg0: i32) -> (i32, i32) {
    %c0_i32 = arith.constant 0 : i32
    %c0_i32_0 = arith.constant 0 : i32
    %c0_i32_1 = arith.constant 0 : i32
    return %c0_i32, %c0_i32_0 : i32, i32
  }
  func.func @transform_7(%arg0: i32) -> (i32, i32) {
    %c0_i32 = arith.constant 0 : i32
    %c0_i32_0 = arith.constant 0 : i32
    return %arg0, %c0_i32 : i32, i32
  }
}

</mosaic_0001>

<bundles_post_ra>
// kernel: value_network_forward.1
= control target key start
LH: loop header
LB: loop body
LE: loop exit
PB: predicated region body
PF: predicated region fallthrough
CT: control target
= control target key end

     0   :  { %v439_v0 = vmov 0.0   ;;  %vm440_vm0 = vmmov 0   ;;  %vm78_vm1 = vcmask 130048   ;;  %v441_v12 = vmov 0.0|0.0   ;;  %s572_s1 = inlined_call_operand.vmem [shape: bf16[16,128], index: 1, kind: input, shape index: {}]   ;;  %s573_s0 = inlined_call_operand.vmem [shape: f32[8,16], index: 0, kind: input, shape index: {}]   ;;  %s574_s3 = inlined_call_operand.vmem [shape: bf16[128,128], index: 3, kind: input, shape index: {}]   ;;  %s575_s5 = inlined_call_operand.vmem [shape: f32[128,4], index: 5, kind: input, shape index: {}]   ;;  %s576_s2 = inlined_call_operand.vmem [shape: f32[1,128], index: 2, kind: input, shape index: {}]   ;;  %s577_s4 = inlined_call_operand.vmem [shape: f32[1,128], index: 4, kind: input, shape index: {}]   ;;  %s578_s6 = inlined_call_operand.vmem [shape: f32[1,4], index: 6, kind: input, shape index: {}]   ;;  %s579_s7 = inlined_call_operand.vmem [shape: f32[8,4], index: 7, kind: output, shape index: {}]  }
   0x1   :  { %342 = vmatprep.subr.bf16.mxu0 %v439_v0  ;;  %v430_v1 = vld [vmem:[%s572_s1] sm:$0xff]   ;;  %344 = vmatprep.mubr.msk.bf16.mxu0 %vm440_vm0, %v439_v0  ;;  %v432_v5 = vld [vmem:[%s574_s3 + $0x8] sm:$0xff]   ;;  %v433_v6 = vld [vmem:[%s574_s3 + $0x10] sm:$0xff]   ;;  %vm295_vm2 = vcmask 31744  }
   0x2   :  { %v64_v2 = vld [vmem:[%s573_s0] sm:$0xff]  ;;  %348 = vmatprep.subr.bf16.mxu1 %v439_v0  ;;  %364 = vmatprep.mubr.msk.bf16.mxu1 %vm440_vm0, %v439_v0  ;;  %v434_v7 = vld [vmem:[%s574_s3 + $0x18] sm:$0xff]   ;;  %v436_v9 = vld [vmem:[%s574_s3 + $0x28] sm:$0xff]  }
   0x3   :  { %343 = vmatpush3.bf16.msra.mxu0 %v430_v1  ;;  %v65_v3 = vpack.c.bf16 %v64_v2, %v64_v2  ;;  %v431_v4 = vld [vmem:[%s574_s3] sm:$0xff]   ;;  %v437_v10 = vld [vmem:[%s574_s3 + $0x30] sm:$0xff]   ;;  %v438_v11 = vld [vmem:[%s574_s3 + $0x38] sm:$0xff]  }
   0x4   :  { %349 = vmatpush3.bf16.msra.mxu1 %v431_v4  ;;  %v435_v8 = vld [vmem:[%s574_s3 + $0x20] sm:$0xff]   ;;  %403 = vmatprep.subr.bf16.mxu0 %v441_v12  ;;  %v48_v14 = vld [vmem:[%s575_s5 + $0x8] sm:$0xff]  ;;  %v49_v15 = vld [vmem:[%s575_s5 + $0x10] sm:$0xff] }
   0x5   :  { %350 = vmatprep.subr.bf16.mxu1 %v439_v0  ;;  %v47_v13 = vld [vmem:[%s575_s5] sm:$0xff]  ;;  %v50_v17 = vld [vmem:[%s575_s5 + $0x18] sm:$0xff]  ;;  %v52_v20 = vld [vmem:[%s575_s5 + $0x28] sm:$0xff] }
   0x6   :  { %345 = vmatmul.mubr.msk.bf16.vlgmr.msra.gmra.mrb[0].mxu0 %vm78_vm1, %v65_v3  ;;  %v404_v16 = vpack.c.bf16 %v48_v14, %v47_v13  ;;  %v407_v18 = vpack.c.bf16 %v50_v17, %v49_v15  ;;  %v51_v19 = vld [vmem:[%s575_s5 + $0x20] sm:$0xff]  ;;  %v53_v22 = vld [vmem:[%s575_s5 + $0x30] sm:$0xff]  ;;  %v54_v23 = vld [vmem:[%s575_s5 + $0x38] sm:$0xff] }
   0x7   :  { %400 = vmatprep.mubr.msk.f32.mxu0 %vm440_vm0, %v439_v0  ;;  %v410_v21 = vpack.c.bf16 %v52_v20, %v51_v19  ;;  %v413_v24 = vpack.c.bf16 %v54_v23, %v53_v22  ;;  %v55_v25 = vld [vmem:[%s575_s5 + $0x40] sm:$0xff]  ;;  %v56_v26 = vld [vmem:[%s575_s5 + $0x48] sm:$0xff]  ;;  %v57_v28 = vld [vmem:[%s575_s5 + $0x50] sm:$0xff] }
   0x8   :  { %351 = vmatpush3.bf16.msra.mxu1 %v432_v5  ;;  %405 = vmatpush3.bf16.msra.mxu0 %v404_v16  ;;  %v416_v27 = vpack.c.bf16 %v56_v26, %v55_v25  ;;  %v58_v29 = vld [vmem:[%s575_s5 + $0x58] sm:$0xff]  ;;  %v59_v31 = vld [vmem:[%s575_s5 + $0x60] sm:$0xff]  ;;  %v60_v32 = vld [vmem:[%s575_s5 + $0x68] sm:$0xff] }
   0x9   :  { %352 = vmatprep.subr.bf16.mxu1 %v439_v0  ;;  %406 = vmatprep.subr.bf16.mxu0 %v441_v12  ;;  %v419_v30 = vpack.c.bf16 %v58_v29, %v57_v28  ;;  %v422_v33 = vpack.c.bf16 %v60_v32, %v59_v31  ;;  %v301_v34 = vld [vmem:[%s576_s2] ss:$0 sm:$0xff]  ;;  %v61_v42 = vld [vmem:[%s575_s5 + $0x70] sm:$0xff]  ;;  %v62_v43 = vld [vmem:[%s575_s5 + $0x78] sm:$0xff] }
   0xa   :  { %v425_v44 = vpack.c.bf16 %v62_v43, %v61_v42  ;;  %v304_v45 = vld [vmem:[%s577_s4] ss:$0 sm:$0xff] }
   0xb   :  { %v313_v52 = vld [vmem:[%s578_s6] ss:$0 sm:$0xff] }
   0xc   :  { %353 = vmatpush3.bf16.msra.mxu1 %v433_v6  ;;  %408 = vmatpush3.bf16.msra.mxu0 %v407_v18 }
   0xd   :  { %354 = vmatprep.subr.bf16.mxu1 %v439_v0  ;;  %409 = vmatprep.subr.bf16.mxu0 %v441_v12 }
  0x10   :  { %355 = vmatpush3.bf16.msra.mxu1 %v434_v7  ;;  %411 = vmatpush3.bf16.msra.mxu0 %v410_v21 }
  0x11   :  { %356 = vmatprep.subr.bf16.mxu1 %v439_v0  ;;  %412 = vmatprep.subr.bf16.mxu0 %v441_v12 }
  0x14   :  { %357 = vmatpush3.bf16.msra.mxu1 %v435_v8  ;;  %414 = vmatpush3.bf16.msra.mxu0 %v413_v24 }
  0x15   :  { %358 = vmatprep.subr.bf16.mxu1 %v439_v0  ;;  %415 = vmatprep.subr.bf16.mxu0 %v441_v12 }
  0x18   :  { %359 = vmatpush3.bf16.msra.mxu1 %v436_v9  ;;  %417 = vmatpush3.bf16.msra.mxu0 %v416_v27 }
  0x19   :  { %360 = vmatprep.subr.bf16.mxu1 %v439_v0  ;;  %418 = vmatprep.subr.bf16.mxu0 %v441_v12 }
  0x1c   :  { %361 = vmatpush3.bf16.msra.mxu1 %v437_v10  ;;  %420 = vmatpush3.bf16.msra.mxu0 %v419_v30 }
  0x1d   :  { %362 = vmatprep.subr.bf16.mxu1 %v439_v0  ;;  %421 = vmatprep.subr.bf16.mxu0 %v441_v12 }
  0x20   :  { %363 = vmatpush3.bf16.msra.mxu1 %v438_v11  ;;  %423 = vmatpush3.bf16.msra.mxu0 %v422_v33 }
  0x21   :  { %424 = vmatprep.subr.bf16.mxu0 %v441_v12 }
  0x24   :  { %426 = vmatpush3.bf16.msra.mxu0 %v425_v44 }
  0xd9   :  { %v116_v35 = vpop.f32.mrb[0].mxu0 }
  0xda   :  { %v117_v36 = vadd.f32 %v301_v34, %v116_v35  ;;  %v346_v37 = vpop.f32.mrb[1].mxu0 }
  0xdb   :  { %v119_v38 = vpop.f32.mrb[2].mxu0 }
  0xdc   :  { %v122_v39 = vmax.f32 %v117_v36, 0.0  ;;  %v347_v40 = vpop.f32.mrb[3].mxu0 }
  0xde   :  { %v123_v41 = vpack.c.bf16 %v122_v39, %v122_v39 }
  0xe0   :  { %365 = vmatmul.mubr.bf16.vlgmr.msra.gmra.mrb[0].mxu1 %v123_v41 }
 0x1b3   :  { %v212_v46 = vpop.f32.mrb[0].mxu1 }
 0x1b4   :  { %v213_v47 = vadd.f32 %v304_v45, %v212_v46  ;;  %v366_v48 = vpop.f32.mrb[1].mxu1 }
 0x1b5   :  { %v215_v49 = vpop.f32.mrb[2].mxu1 }
 0x1b6   :  { %v218_v50 = vmax.f32 %v213_v47, 0.0  ;;  %v367_v51 = vpop.f32.mrb[3].mxu1 }
 0x1b8   :  { %401 = vmatmul.mubr.f32.vlgmr.msra.gmra.mrb[4].mxu0 %v218_v50 }
 0x28b   :  { %v291_v53 = vpop.f32.mrb[4].mxu0 }
 0x28c   :  { %v292_v54 = vadd.f32 %v313_v52, %v291_v53  ;;  %v402_v55 = vpop.f32.mrb[5].mxu0 }
 0x28e   :  { %296 = vst.msk [vmem:[%s579_s7] sm:$0xff] %vm295_vm2, %v292_v54 }

</bundles_post_ra>
